<compile_context>
chip_gen: v7x
topology: tpu7x:2x2x1
jax: 0.10.0
libtpu: 0.0.40
codegen_flags: <defaults>
</compile_context>

<pallas_src>
import math
import functools

import jax
import jax.numpy as jnp
from jax import lax
from jax.experimental import pallas as pl
from jax.experimental.pallas import tpu as pltpu


# ---------------------------------------------------------------------------
# Fused per-(sequence, layer) kernel
# ---------------------------------------------------------------------------

def _layernorm(x, gamma, beta, eps=1e-5):
    mean = jnp.mean(x, axis=-1, keepdims=True)
    var = jnp.mean((x - mean) ** 2, axis=-1, keepdims=True)
    return (x - mean) * lax.rsqrt(var + eps) * gamma + beta


def _encoder_kernel(n_head,
                    x_ref, winT_ref, posin_ref,
                    wqkvT_ref, bqkv_ref, woT_ref, w1T_ref, w2T_ref,
                    vecD_ref, b1_ref,
                    o_ref):
    """One (sequence b, layer l) grid step.

    Block shapes seen by the kernel (leading batch/layer dims squeezed):
      x_ref:     (S, E)        raw input sequence
      winT_ref:  (E, D)        posin_ref: (S, D) = PE[:S] + b_in
      wqkvT_ref: (D, 3D)       q-scale pre-folded into the first D columns
      bqkv_ref:  (1, 3D)       woT_ref: (D, D)
      w1T_ref:   (D, H)        w2T_ref: (H, D)
      vecD_ref:  (6, D)  rows = [bo, ln1g, ln1b, b2, ln2g, ln2b]
      b1_ref:    (1, H)
      o_ref:     (S, D)        layer-input carry + final output
    """
    l = pl.program_id(1)

    # ---- linear_in + positional encoding, only on the first layer step ----
    # (dropouts are identity in eval mode)
    @pl.when(l == 0)
    def _():
        o_ref[...] = jnp.dot(x_ref[...], winT_ref[...],
                             preferred_element_type=jnp.float32) + posin_ref[...]

    x = o_ref[...]                                  # (S, D) layer input
    D = x.shape[-1]
    hd = D // n_head

    vD = vecD_ref[...]
    bo, ln1g, ln1b = vD[0:1], vD[1:2], vD[2:3]
    b2, ln2g, ln2b = vD[3:4], vD[4:5], vD[5:6]

    # --- self attention ----------------------------------------------------
    # Single fused qkv matmul (one MXU push); q already scaled by 1/sqrt(hd).
    qkv = jnp.dot(x, wqkvT_ref[...],
                  preferred_element_type=jnp.float32) + bqkv_ref[...]

    wo = woT_ref[...]
    attn = jnp.zeros_like(x)
    for h in range(n_head):                          # static unroll over heads
        sl = slice(h * hd, (h + 1) * hd)
        qh = qkv[:, sl]
        kh = qkv[:, D + h * hd:D + (h + 1) * hd]
        vh = qkv[:, 2 * D + h * hd:2 * D + (h + 1) * hd]
        s = lax.dot_general(qh, kh, (((1,), (1,)), ((), ())),
                            preferred_element_type=jnp.float32)      # (S, S)
        s = s - jnp.max(s, axis=-1, keepdims=True)
        p = jnp.exp(s)
        p = p * pl.reciprocal(jnp.sum(p, axis=-1, keepdims=True), approx=True)
        o_h = jnp.dot(p, vh, preferred_element_type=jnp.float32)     # (S, hd)
        # Accumulate through sublane slices of W_o^T: no lane-concat (XLU).
        attn = attn + jnp.dot(o_h, wo[sl, :],
                              preferred_element_type=jnp.float32)
    attn = attn + bo

    # --- add & norm 1 --------------------------------------------------------
    x1 = _layernorm(x + attn, ln1g, ln1b)

    # --- feed-forward (relu) -------------------------------------------------
    h1 = jnp.maximum(
        jnp.dot(x1, w1T_ref[...], preferred_element_type=jnp.float32)
        + b1_ref[...], 0.0)
    h2 = jnp.dot(h1, w2T_ref[...], preferred_element_type=jnp.float32) + b2

    # --- add & norm 2 (write back the layer-output carry) -------------------
    o_ref[...] = _layernorm(x1 + h2, ln2g, ln2b)


# ---------------------------------------------------------------------------
# One-time parameter preparation + Pallas wrapper
# ---------------------------------------------------------------------------

def prepare_params(params, pe, seq, n_head):
    """Hoist every transpose / scale-fold / bias stack out of the forward path."""
    D = params["w_in"].shape[0]
    hd = D // n_head
    scale = 1.0 / math.sqrt(hd)
    # Fold the 1/sqrt(hd) scale into the q columns of the fused qkv projection.
    col_scale = jnp.concatenate([jnp.full((D,), scale, jnp.float32),
                                 jnp.ones((2 * D,), jnp.float32)])

    layers = params["layers"]

    def stack(fn):
        return jnp.stack([fn(lp) for lp in layers])

    return {
        "winT": jnp.transpose(params["w_in"]),                          # (E, D)
        # linear_in bias + positional encoding folded into one additive term.
        "posin": pe[:seq] + params["b_in"][None, :],                    # (S, D)
        "wqkvT": stack(lambda lp: jnp.transpose(lp["wqkv"])
                       * col_scale[None, :]),                           # (L,D,3D)
        "bqkv": stack(lambda lp: (lp["bqkv"] * col_scale)[None, :]),    # (L,1,3D)
        "woT": stack(lambda lp: jnp.transpose(lp["wo"])),               # (L,D,D)
        "w1T": stack(lambda lp: jnp.transpose(lp["w1"])),               # (L,D,H)
        "w2T": stack(lambda lp: jnp.transpose(lp["w2"])),               # (L,H,D)
        "vecD": stack(lambda lp: jnp.stack([
            lp["bo"], lp["ln1g"], lp["ln1b"],
            lp["b2"], lp["ln2g"], lp["ln2b"]])),                        # (L,6,D)
        "b1": stack(lambda lp: lp["b1"][None, :]),                      # (L,1,H)
    }


def attention_transformer_ning_pallas(src, prep, n_head):
    """Fused forward: grid = (batch 'parallel', layer 'arbitrary')."""
    B, S, E = src.shape
    D = prep["winT"].shape[1]
    H = prep["w1T"].shape[2]
    L = prep["wqkvT"].shape[0]

    kernel = functools.partial(_encoder_kernel, n_head)

    # NOTE: at these sizes all last dims equal the full array dims, so the
    # (8,128) block constraint is satisfied; for large B*S*D a lane-dense
    # output layout (last dim multiple of 128) would be the next lever.
    out = pl.pallas_call(
        kernel,
        out_shape=jax.ShapeDtypeStruct((B, S, D), jnp.float32),
        grid=(B, L),
        in_specs=[
            pl.BlockSpec((None, S, E), lambda b, l: (b, 0, 0)),      # src
            pl.BlockSpec((E, D), lambda b, l: (0, 0)),               # winT
            pl.BlockSpec((S, D), lambda b, l: (0, 0)),               # posin
            pl.BlockSpec((None, D, 3 * D), lambda b, l: (l, 0, 0)),  # wqkvT
            pl.BlockSpec((None, 1, 3 * D), lambda b, l: (l, 0, 0)),  # bqkv
            pl.BlockSpec((None, D, D), lambda b, l: (l, 0, 0)),      # woT
            pl.BlockSpec((None, D, H), lambda b, l: (l, 0, 0)),      # w1T
            pl.BlockSpec((None, H, D), lambda b, l: (l, 0, 0)),      # w2T
            pl.BlockSpec((None, 6, D), lambda b, l: (l, 0, 0)),      # vecD
            pl.BlockSpec((None, 1, H), lambda b, l: (l, 0, 0)),      # b1
        ],
        # Same output block for every l -> activation stays resident in VMEM
        # across the layer axis (carry), written back to HBM once per sequence.
        out_specs=pl.BlockSpec((None, S, D), lambda b, l: (b, 0, 0)),
        compiler_params=pltpu.CompilerParams(
            dimension_semantics=("parallel", "arbitrary"),
            vmem_limit_bytes=32 * 1024 * 1024,
        ),
    )(src,
      prep["winT"], prep["posin"],
      prep["wqkvT"], prep["bqkv"], prep["woT"], prep["w1T"], prep["w2T"],
      prep["vecD"], prep["b1"])
    return out


# ---------------------------------------------------------------------------
# Deterministic parameter construction + pure-JAX reference
# ---------------------------------------------------------------------------

def make_positional_encoding(max_len, d_model):
    # mirrors PositionalEncoding.__init__ (even d_model path)
    position = jnp.arange(max_len, dtype=jnp.float32)[:, None]
    div_term = jnp.exp(jnp.arange(0, d_model, 2, dtype=jnp.float32)
                       * (-math.log(10000.0) / d_model))
    pe = jnp.zeros((max_len, d_model), dtype=jnp.float32)
    pe = pe.at[:, 0::2].set(jnp.sin(position * div_term))
    pe = pe.at[:, 1::2].set(jnp.cos(position * div_term))
    return pe


def init_params(key, eeg_channel, d_model, d_hid, n_layers):
    def nrm(k, shape, scale=0.1):
        return scale * jax.random.normal(k, shape, dtype=jnp.float32)

    keys = iter(jax.random.split(key, 2 + 12 * n_layers))
    params = {
        "w_in": nrm(next(keys), (d_model, eeg_channel)),
        "b_in": nrm(next(keys), (d_model,)),
        "layers": [],
    }
    for _ in range(n_layers):
        lp = {
            "wqkv": nrm(next(keys), (3 * d_model, d_model)),
            "bqkv": nrm(next(keys), (3 * d_model,)),
            "wo":   nrm(next(keys), (d_model, d_model)),
            "bo":   nrm(next(keys), (d_model,)),
            "ln1g": 1.0 + nrm(next(keys), (d_model,), 0.02),
            "ln1b": nrm(next(keys), (d_model,), 0.02),
            "w1":   nrm(next(keys), (d_hid, d_model)),
            "b1":   nrm(next(keys), (d_hid,)),
            "w2":   nrm(next(keys), (d_model, d_hid)),
            "b2":   nrm(next(keys), (d_model,)),
            "ln2g": 1.0 + nrm(next(keys), (d_model,), 0.02),
            "ln2b": nrm(next(keys), (d_model,), 0.02),
        }
        params["layers"].append(lp)
    return params


def _ref_layernorm(x, g, b, eps=1e-5):
    m = jnp.mean(x, axis=-1, keepdims=True)
    v = jnp.mean((x - m) ** 2, axis=-1, keepdims=True)
    return (x - m) / jnp.sqrt(v + eps) * g + b


def reference_forward(src, params, pe, n_head):
    B, S, _ = src.shape
    x = src @ params["w_in"].T + params["b_in"] + pe[None, :S, :]
    for lp in params["layers"]:
        D = x.shape[-1]
        hd = D // n_head
        qkv = x @ lp["wqkv"].T + lp["bqkv"]
        q, k, v = jnp.split(qkv, 3, axis=-1)
        q = q.reshape(B, S, n_head, hd).transpose(0, 2, 1, 3) / math.sqrt(hd)
        k = k.reshape(B, S, n_head, hd).transpose(0, 2, 1, 3)
        v = v.reshape(B, S, n_head, hd).transpose(0, 2, 1, 3)
        s = q @ k.transpose(0, 1, 3, 2)
        p = jax.nn.softmax(s, axis=-1)
        o = (p @ v).transpose(0, 2, 1, 3).reshape(B, S, D)
        o = o @ lp["wo"].T + lp["bo"]
        x1 = _ref_layernorm(x + o, lp["ln1g"], lp["ln1b"])
        f = jnp.maximum(x1 @ lp["w1"].T + lp["b1"], 0.0) @ lp["w2"].T + lp["b2"]
        x = _ref_layernorm(x1 + f, lp["ln2g"], lp["ln2b"])
    return x


# ---------------------------------------------------------------------------
# Main
# ---------------------------------------------------------------------------

if __name__ == "__main__":
    # module hyperparameters (small, consistent with the forward pass)
    eeg_channel = 4
    d_model = 32
    n_head = 4
    d_hid = 64
    n_layers = 2
    seq_len_cfg = 1600                      # module's seq_len -> max_len for PE
    max_len = int((seq_len_cfg - 1) // 2)   # 799

    batch, seq = 2, 8                       # actual input [B, S, eeg_channel]

    key = jax.random.PRNGKey(0)
    k_x, k_p = jax.random.split(key)
    src = jax.random.normal(k_x, (batch, seq, eeg_channel), dtype=jnp.float32)

    params = init_params(k_p, eeg_channel, d_model, d_hid, n_layers)
    pe = make_positional_encoding(max_len, d_model)

    # one-time parameter packing (transposes, qkv fusion, scale folding)
    prep = prepare_params(params, pe, seq, n_head)

    out = attention_transformer_ning_pallas(src, prep, n_head)
    out = jax.block_until_ready(out)

    ref = reference_forward(src, params, pe, n_head)
    assert out.shape == (batch, seq, d_model)
    # Tolerance relaxed vs exact-division variant because the softmax
    # denominator uses the EUP approximate reciprocal (pl.reciprocal approx=True).
    max_err = float(jnp.max(jnp.abs(out - ref)))
    assert jnp.allclose(out, ref, atol=2e-3, rtol=2e-3), (
        f"Pallas output mismatch, max abs err = {max_err}")

    print("KERNEL_OK")
</pallas_src>

<mosaic_0001>
module attributes {stable_mosaic.version = 11 : i64} {
  func.func @_encoder_kernel(%arg0: i32, %arg1: i32, %arg2: memref<1x8x4xf32, #tpu.memory_space<vmem>>, %arg3: memref<4x32xf32, #tpu.memory_space<vmem>>, %arg4: memref<8x32xf32, #tpu.memory_space<vmem>>, %arg5: memref<1x32x96xf32, #tpu.memory_space<vmem>>, %arg6: memref<1x1x96xf32, #tpu.memory_space<vmem>>, %arg7: memref<1x32x32xf32, #tpu.memory_space<vmem>>, %arg8: memref<1x32x64xf32, #tpu.memory_space<vmem>>, %arg9: memref<1x64x32xf32, #tpu.memory_space<vmem>>, %arg10: memref<1x6x32xf32, #tpu.memory_space<vmem>>, %arg11: memref<1x1x64xf32, #tpu.memory_space<vmem>>, %arg12: memref<1x8x32xf32, #tpu.memory_space<vmem>>) attributes {dimension_semantics = [#tpu.dimension_semantics<parallel>, #tpu.dimension_semantics<arbitrary>], iteration_bounds = array<i64: 2, 2>, scalar_prefetch = 0 : i64, scratch_operands = 0 : i64, tpu.core_type = #tpu.core_type<tc>, window_params = [{transform_indices = @transform_0, window_bounds = array<i64: 1, 8, 4>}, {pipeline_mode = #tpu.pipeline_mode<synchronous>, transform_indices = @transform_1, window_bounds = array<i64: 4, 32>}, {pipeline_mode = #tpu.pipeline_mode<synchronous>, transform_indices = @transform_2, window_bounds = array<i64: 8, 32>}, {transform_indices = @transform_3, window_bounds = array<i64: 1, 32, 96>}, {transform_indices = @transform_4, window_bounds = array<i64: 1, 1, 96>}, {transform_indices = @transform_5, window_bounds = array<i64: 1, 32, 32>}, {transform_indices = @transform_6, window_bounds = array<i64: 1, 32, 64>}, {transform_indices = @transform_7, window_bounds = array<i64: 1, 64, 32>}, {transform_indices = @transform_8, window_bounds = array<i64: 1, 6, 32>}, {transform_indices = @transform_9, window_bounds = array<i64: 1, 1, 64>}, {transform_indices = @transform_10, window_bounds = array<i64: 1, 8, 32>}]} {
    %c0_i32 = arith.constant 0 : i32
    %0 = arith.cmpi eq, %arg1, %c0_i32 : i32
    %1 = arith.extui %0 : i1 to i32
    %c0_i32_0 = arith.constant 0 : i32
    %2 = arith.cmpi ne, %1, %c0_i32_0 : i32
    scf.if %2 {
      %c0_61 = arith.constant 0 : index
      %c0_62 = arith.constant 0 : index
      %c0_63 = arith.constant 0 : index
      %160 = vector.load %arg2[%c0_61, %c0_62, %c0_63] : memref<1x8x4xf32, #tpu.memory_space<vmem>>, vector<1x8x4xf32>
      %161 = vector.shape_cast %160 : vector<1x8x4xf32> to vector<8x4xf32>
      %c0_64 = arith.constant 0 : index
      %c0_65 = arith.constant 0 : index
      %162 = vector.load %arg3[%c0_64, %c0_65] : memref<4x32xf32, #tpu.memory_space<vmem>>, vector<4x32xf32>
      %cst_66 = arith.constant dense<0.000000e+00> : vector<8x32xf32>
      %163 = tpu.matmul %161, %162, %cst_66 {dimension_numbers = #tpu.dot_dimension_numbers<[1], [0], [0], [1], [0, 0, 1, 1], [], []>} : vector<8x4xf32>, vector<4x32xf32>, vector<8x32xf32> -> vector<8x32xf32>
      %c0_67 = arith.constant 0 : index
      %c0_68 = arith.constant 0 : index
      %164 = vector.load %arg4[%c0_67, %c0_68] : memref<8x32xf32, #tpu.memory_space<vmem>>, vector<8x32xf32>
      %165 = arith.addf %163, %164 : vector<8x32xf32>
      %c0_69 = arith.constant 0 : index
      %c0_70 = arith.constant 0 : index
      %c0_71 = arith.constant 0 : index
      %166 = vector.load %arg12[%c0_69, %c0_70, %c0_71] : memref<1x8x32xf32, #tpu.memory_space<vmem>>, vector<1x8x32xf32>
      %167 = vector.shape_cast %166 : vector<1x8x32xf32> to vector<8x32xf32>
      %168 = vector.shape_cast %165 : vector<8x32xf32> to vector<1x8x32xf32>
      tpu.vector_store %arg12[%c0_69, %c0_70, %c0_71], %168 {strides = array<i32>} : memref<1x8x32xf32, #tpu.memory_space<vmem>>, vector<1x8x32xf32>,
    } else {
    }
    %c0 = arith.constant 0 : index
    %c0_1 = arith.constant 0 : index
    %c0_2 = arith.constant 0 : index
    %3 = vector.load %arg12[%c0, %c0_1, %c0_2] : memref<1x8x32xf32, #tpu.memory_space<vmem>>, vector<1x8x32xf32>
    %4 = vector.shape_cast %3 : vector<1x8x32xf32> to vector<8x32xf32>
    %c0_3 = arith.constant 0 : index
    %c0_4 = arith.constant 0 : index
    %c0_5 = arith.constant 0 : index
    %5 = vector.load %arg10[%c0_3, %c0_4, %c0_5] : memref<1x6x32xf32, #tpu.memory_space<vmem>>, vector<1x6x32xf32>
    %6 = vector.shape_cast %5 : vector<1x6x32xf32> to vector<6x32xf32>
    %7 = vector.extract_strided_slice %6 {offsets = [0, 0], sizes = [1, 32], strides = [1, 1]} : vector<6x32xf32> to vector<1x32xf32>
    %8 = vector.extract_strided_slice %6 {offsets = [1, 0], sizes = [1, 32], strides = [1, 1]} : vector<6x32xf32> to vector<1x32xf32>
    %9 = vector.extract_strided_slice %6 {offsets = [2, 0], sizes = [1, 32], strides = [1, 1]} : vector<6x32xf32> to vector<1x32xf32>
    %10 = vector.extract_strided_slice %6 {offsets = [3, 0], sizes = [1, 32], strides = [1, 1]} : vector<6x32xf32> to vector<1x32xf32>
    %11 = vector.extract_strided_slice %6 {offsets = [4, 0], sizes = [1, 32], strides = [1, 1]} : vector<6x32xf32> to vector<1x32xf32>
    %12 = vector.extract_strided_slice %6 {offsets = [5, 0], sizes = [1, 32], strides = [1, 1]} : vector<6x32xf32> to vector<1x32xf32>
    %c0_6 = arith.constant 0 : index
    %c0_7 = arith.constant 0 : index
    %c0_8 = arith.constant 0 : index
    %13 = vector.load %arg5[%c0_6, %c0_7, %c0_8] : memref<1x32x96xf32, #tpu.memory_space<vmem>>, vector<1x32x96xf32>
    %14 = vector.shape_cast %13 : vector<1x32x96xf32> to vector<32x96xf32>
    %cst = arith.constant dense<0.000000e+00> : vector<8x96xf32>
    %15 = tpu.matmul %4, %14, %cst {dimension_numbers = #tpu.dot_dimension_numbers<[1], [0], [0], [1], [0, 0, 1, 1], [], []>} : vector<8x32xf32>, vector<32x96xf32>, vector<8x96xf32> -> vector<8x96xf32>
    %c0_9 = arith.constant 0 : index
    %c0_10 = arith.constant 0 : index
    %c0_11 = arith.constant 0 : index
    %16 = vector.load %arg6[%c0_9, %c0_10, %c0_11] : memref<1x1x96xf32, #tpu.memory_space<vmem>>, vector<1x1x96xf32>
    %17 = vector.shape_cast %16 : vector<1x1x96xf32> to vector<1x96xf32>
    %18 = vector.broadcast %17 : vector<1x96xf32> to vector<8x96xf32>
    %19 = arith.addf %15, %18 : vector<8x96xf32>
    %c0_12 = arith.constant 0 : index
    %c0_13 = arith.constant 0 : index
    %c0_14 = arith.constant 0 : index
    %20 = vector.load %arg7[%c0_12, %c0_13, %c0_14] : memref<1x32x32xf32, #tpu.memory_space<vmem>>, vector<1x32x32xf32>
    %21 = vector.shape_cast %20 : vector<1x32x32xf32> to vector<32x32xf32>
    %cst_15 = arith.constant 0.000000e+00 : f32
    %22 = vector.broadcast %cst_15 : f32 to vector<8x32xf32>
    %23 = vector.extract_strided_slice %19 {offsets = [0, 0], sizes = [8, 8], strides = [1, 1]} : vector<8x96xf32> to vector<8x8xf32>
    %24 = vector.extract_strided_slice %19 {offsets = [0, 32], sizes = [8, 8], strides = [1, 1]} : vector<8x96xf32> to vector<8x8xf32>
    %25 = vector.extract_strided_slice %19 {offsets = [0, 64], sizes = [8, 8], strides = [1, 1]} : vector<8x96xf32> to vector<8x8xf32>
    %cst_16 = arith.constant dense<0.000000e+00> : vector<8x8xf32>
    %26 = tpu.matmul %23, %24, %cst_16 {dimension_numbers = #tpu.dot_dimension_numbers<[1], [1], [0], [0], [0, 0, 1, 0], [], []>} : vector<8x8xf32>, vector<8x8xf32>, vector<8x8xf32> -> vector<8x8xf32>
    %cst_17 = arith.constant dense<0xFF800000> : vector<8xf32>
    %27 = vector.multi_reduction <maximumf>, %26, %cst_17 [1] : vector<8x8xf32> to vector<8xf32>
    %28 = vector.shape_cast %27 : vector<8xf32> to vector<8x1xf32>
    %29 = vector.broadcast %28 : vector<8x1xf32> to vector<8x8xf32>
    %30 = arith.subf %26, %29 : vector<8x8xf32>
    %31 = math.exp %30 : vector<8x8xf32>
    %cst_18 = arith.constant dense<0.000000e+00> : vector<8xf32>
    %32 = vector.multi_reduction <add>, %31, %cst_18 [1] : vector<8x8xf32> to vector<8xf32>
    %33 = vector.shape_cast %32 : vector<8xf32> to vector<8x1xf32>
    %34 = tpu.reciprocal %33 {approx = true} : vector<8x1xf32> -> vector<8x1xf32>
    %35 = vector.broadcast %34 : vector<8x1xf32> to vector<8x8xf32>
    %36 = arith.mulf %31, %35 : vector<8x8xf32>
    %cst_19 = arith.constant dense<0.000000e+00> : vector<8x8xf32>
    %37 = tpu.matmul %36, %25, %cst_19 {dimension_numbers = #tpu.dot_dimension_numbers<[1], [0], [0], [1], [0, 0, 1, 1], [], []>} : vector<8x8xf32>, vector<8x8xf32>, vector<8x8xf32> -> vector<8x8xf32>
    %38 = vector.extract_strided_slice %21 {offsets = [0, 0], sizes = [8, 32], strides = [1, 1]} : vector<32x32xf32> to vector<8x32xf32>
    %cst_20 = arith.constant dense<0.000000e+00> : vector<8x32xf32>
    %39 = tpu.matmul %37, %38, %cst_20 {dimension_numbers = #tpu.dot_dimension_numbers<[1], [0], [0], [1], [0, 0, 1, 1], [], []>} : vector<8x8xf32>, vector<8x32xf32>, vector<8x32xf32> -> vector<8x32xf32>
    %40 = arith.addf %22, %39 : vector<8x32xf32>
    %41 = vector.extract_strided_slice %19 {offsets = [0, 8], sizes = [8, 8], strides = [1, 1]} : vector<8x96xf32> to vector<8x8xf32>
    %42 = vector.extract_strided_slice %19 {offsets = [0, 40], sizes = [8, 8], strides = [1, 1]} : vector<8x96xf32> to vector<8x8xf32>
    %43 = vector.extract_strided_slice %19 {offsets = [0, 72], sizes = [8, 8], strides = [1, 1]} : vector<8x96xf32> to vector<8x8xf32>
    %cst_21 = arith.constant dense<0.000000e+00> : vector<8x8xf32>
    %44 = tpu.matmul %41, %42, %cst_21 {dimension_numbers = #tpu.dot_dimension_numbers<[1], [1], [0], [0], [0, 0, 1, 0], [], []>} : vector<8x8xf32>, vector<8x8xf32>, vector<8x8xf32> -> vector<8x8xf32>
    %cst_22 = arith.constant dense<0xFF800000> : vector<8xf32>
    %45 = vector.multi_reduction <maximumf>, %44, %cst_22 [1] : vector<8x8xf32> to vector<8xf32>
    %46 = vector.shape_cast %45 : vector<8xf32> to vector<8x1xf32>
    %47 = vector.broadcast %46 : vector<8x1xf32> to vector<8x8xf32>
    %48 = arith.subf %44, %47 : vector<8x8xf32>
    %49 = math.exp %48 : vector<8x8xf32>
    %cst_23 = arith.constant dense<0.000000e+00> : vector<8xf32>
    %50 = vector.multi_reduction <add>, %49, %cst_23 [1] : vector<8x8xf32> to vector<8xf32>
    %51 = vector.shape_cast %50 : vector<8xf32> to vector<8x1xf32>
    %52 = tpu.reciprocal %51 {approx = true} : vector<8x1xf32> -> vector<8x1xf32>
    %53 = vector.broadcast %52 : vector<8x1xf32> to vector<8x8xf32>
    %54 = arith.mulf %49, %53 : vector<8x8xf32>
    %cst_24 = arith.constant dense<0.000000e+00> : vector<8x8xf32>
    %55 = tpu.matmul %54, %43, %cst_24 {dimension_numbers = #tpu.dot_dimension_numbers<[1], [0], [0], [1], [0, 0, 1, 1], [], []>} : vector<8x8xf32>, vector<8x8xf32>, vector<8x8xf32> -> vector<8x8xf32>
    %56 = vector.extract_strided_slice %21 {offsets = [8, 0], sizes = [8, 32], strides = [1, 1]} : vector<32x32xf32> to vector<8x32xf32>
    %cst_25 = arith.constant dense<0.000000e+00> : vector<8x32xf32>
    %57 = tpu.matmul %55, %56, %cst_25 {dimension_numbers = #tpu.dot_dimension_numbers<[1], [0], [0], [1], [0, 0, 1, 1], [], []>} : vector<8x8xf32>, vector<8x32xf32>, vector<8x32xf32> -> vector<8x32xf32>
    %58 = arith.addf %40, %57 : vector<8x32xf32>
    %59 = vector.extract_strided_slice %19 {offsets = [0, 16], sizes = [8, 8], strides = [1, 1]} : vector<8x96xf32> to vector<8x8xf32>
    %60 = vector.extract_strided_slice %19 {offsets = [0, 48], sizes = [8, 8], strides = [1, 1]} : vector<8x96xf32> to vector<8x8xf32>
    %61 = vector.extract_strided_slice %19 {offsets = [0, 80], sizes = [8, 8], strides = [1, 1]} : vector<8x96xf32> to vector<8x8xf32>
    %cst_26 = arith.constant dense<0.000000e+00> : vector<8x8xf32>
    %62 = tpu.matmul %59, %60, %cst_26 {dimension_numbers = #tpu.dot_dimension_numbers<[1], [1], [0], [0], [0, 0, 1, 0], [], []>} : vector<8x8xf32>, vector<8x8xf32>, vector<8x8xf32> -> vector<8x8xf32>
    %cst_27 = arith.constant dense<0xFF800000> : vector<8xf32>
    %63 = vector.multi_reduction <maximumf>, %62, %cst_27 [1] : vector<8x8xf32> to vector<8xf32>
    %64 = vector.shape_cast %63 : vector<8xf32> to vector<8x1xf32>
    %65 = vector.broadcast %64 : vector<8x1xf32> to vector<8x8xf32>
    %66 = arith.subf %62, %65 : vector<8x8xf32>
    %67 = math.exp %66 : vector<8x8xf32>
    %cst_28 = arith.constant dense<0.000000e+00> : vector<8xf32>
    %68 = vector.multi_reduction <add>, %67, %cst_28 [1] : vector<8x8xf32> to vector<8xf32>
    %69 = vector.shape_cast %68 : vector<8xf32> to vector<8x1xf32>
    %70 = tpu.reciprocal %69 {approx = true} : vector<8x1xf32> -> vector<8x1xf32>
    %71 = vector.broadcast %70 : vector<8x1xf32> to vector<8x8xf32>
    %72 = arith.mulf %67, %71 : vector<8x8xf32>
    %cst_29 = arith.constant dense<0.000000e+00> : vector<8x8xf32>
    %73 = tpu.matmul %72, %61, %cst_29 {dimension_numbers = #tpu.dot_dimension_numbers<[1], [0], [0], [1], [0, 0, 1, 1], [], []>} : vector<8x8xf32>, vector<8x8xf32>, vector<8x8xf32> -> vector<8x8xf32>
    %74 = vector.extract_strided_slice %21 {offsets = [16, 0], sizes = [8, 32], strides = [1, 1]} : vector<32x32xf32> to vector<8x32xf32>
    %cst_30 = arith.constant dense<0.000000e+00> : vector<8x32xf32>
    %75 = tpu.matmul %73, %74, %cst_30 {dimension_numbers = #tpu.dot_dimension_numbers<[1], [0], [0], [1], [0, 0, 1, 1], [], []>} : vector<8x8xf32>, vector<8x32xf32>, vector<8x32xf32> -> vector<8x32xf32>
    %76 = arith.addf %58, %75 : vector<8x32xf32>
    %77 = vector.extract_strided_slice %19 {offsets = [0, 24], sizes = [8, 8], strides = [1, 1]} : vector<8x96xf32> to vector<8x8xf32>
    %78 = vector.extract_strided_slice %19 {offsets = [0, 56], sizes = [8, 8], strides = [1, 1]} : vector<8x96xf32> to vector<8x8xf32>
    %79 = vector.extract_strided_slice %19 {offsets = [0, 88], sizes = [8, 8], strides = [1, 1]} : vector<8x96xf32> to vector<8x8xf32>
    %cst_31 = arith.constant dense<0.000000e+00> : vector<8x8xf32>
    %80 = tpu.matmul %77, %78, %cst_31 {dimension_numbers = #tpu.dot_dimension_numbers<[1], [1], [0], [0], [0, 0, 1, 0], [], []>} : vector<8x8xf32>, vector<8x8xf32>, vector<8x8xf32> -> vector<8x8xf32>
    %cst_32 = arith.constant dense<0xFF800000> : vector<8xf32>
    %81 = vector.multi_reduction <maximumf>, %80, %cst_32 [1] : vector<8x8xf32> to vector<8xf32>
    %82 = vector.shape_cast %81 : vector<8xf32> to vector<8x1xf32>
    %83 = vector.broadcast %82 : vector<8x1xf32> to vector<8x8xf32>
    %84 = arith.subf %80, %83 : vector<8x8xf32>
    %85 = math.exp %84 : vector<8x8xf32>
    %cst_33 = arith.constant dense<0.000000e+00> : vector<8xf32>
    %86 = vector.multi_reduction <add>, %85, %cst_33 [1] : vector<8x8xf32> to vector<8xf32>
    %87 = vector.shape_cast %86 : vector<8xf32> to vector<8x1xf32>
    %88 = tpu.reciprocal %87 {approx = true} : vector<8x1xf32> -> vector<8x1xf32>
    %89 = vector.broadcast %88 : vector<8x1xf32> to vector<8x8xf32>
    %90 = arith.mulf %85, %89 : vector<8x8xf32>
    %cst_34 = arith.constant dense<0.000000e+00> : vector<8x8xf32>
    %91 = tpu.matmul %90, %79, %cst_34 {dimension_numbers = #tpu.dot_dimension_numbers<[1], [0], [0], [1], [0, 0, 1, 1], [], []>} : vector<8x8xf32>, vector<8x8xf32>, vector<8x8xf32> -> vector<8x8xf32>
    %92 = vector.extract_strided_slice %21 {offsets = [24, 0], sizes = [8, 32], strides = [1, 1]} : vector<32x32xf32> to vector<8x32xf32>
    %cst_35 = arith.constant dense<0.000000e+00> : vector<8x32xf32>
    %93 = tpu.matmul %91, %92, %cst_35 {dimension_numbers = #tpu.dot_dimension_numbers<[1], [0], [0], [1], [0, 0, 1, 1], [], []>} : vector<8x8xf32>, vector<8x32xf32>, vector<8x32xf32> -> vector<8x32xf32>
    %94 = arith.addf %76, %93 : vector<8x32xf32>
    %95 = vector.broadcast %7 : vector<1x32xf32> to vector<8x32xf32>
    %96 = arith.addf %94, %95 : vector<8x32xf32>
    %97 = arith.addf %4, %96 : vector<8x32xf32>
    %cst_36 = arith.constant dense<0.000000e+00> : vector<8xf32>
    %98 = vector.multi_reduction <add>, %97, %cst_36 [1] : vector<8x32xf32> to vector<8xf32>
    %99 = vector.shape_cast %98 : vector<8xf32> to vector<8x1xf32>
    %cst_37 = arith.constant 3.200000e+01 : f32
    %100 = vector.broadcast %cst_37 : f32 to vector<8x1xf32>
    %101 = arith.divf %99, %100 : vector<8x1xf32>
    %102 = vector.broadcast %101 : vector<8x1xf32> to vector<8x32xf32>
    %103 = arith.subf %97, %102 : vector<8x32xf32>
    %104 = arith.mulf %103, %103 : vector<8x32xf32>
    %cst_38 = arith.constant dense<0.000000e+00> : vector<8xf32>
    %105 = vector.multi_reduction <add>, %104, %cst_38 [1] : vector<8x32xf32> to vector<8xf32>
    %106 = vector.shape_cast %105 : vector<8xf32> to vector<8x1xf32>
    %cst_39 = arith.constant 3.200000e+01 : f32
    %107 = vector.broadcast %cst_39 : f32 to vector<8x1xf32>
    %108 = arith.divf %106, %107 : vector<8x1xf32>
    %109 = vector.broadcast %101 : vector<8x1xf32> to vector<8x32xf32>
    %110 = arith.subf %97, %109 : vector<8x32xf32>
    %cst_40 = arith.constant 9.99999974E-6 : f32
    %111 = vector.broadcast %cst_40 : f32 to vector<8x1xf32>
    %112 = arith.addf %108, %111 : vector<8x1xf32>
    %113 = math.rsqrt %112 : vector<8x1xf32>
    %114 = vector.broadcast %113 : vector<8x1xf32> to vector<8x32xf32>
    %115 = arith.mulf %110, %114 : vector<8x32xf32>
    %116 = vector.broadcast %8 : vector<1x32xf32> to vector<8x32xf32>
    %117 = arith.mulf %115, %116 : vector<8x32xf32>
    %118 = vector.broadcast %9 : vector<1x32xf32> to vector<8x32xf32>
    %119 = arith.addf %117, %118 : vector<8x32xf32>
    %c0_41 = arith.constant 0 : index
    %c0_42 = arith.constant 0 : index
    %c0_43 = arith.constant 0 : index
    %120 = vector.load %arg8[%c0_41, %c0_42, %c0_43] : memref<1x32x64xf32, #tpu.memory_space<vmem>>, vector<1x32x64xf32>
    %121 = vector.shape_cast %120 : vector<1x32x64xf32> to vector<32x64xf32>
    %cst_44 = arith.constant dense<0.000000e+00> : vector<8x64xf32>
    %122 = tpu.matmul %119, %121, %cst_44 {dimension_numbers = #tpu.dot_dimension_numbers<[1], [0], [0], [1], [0, 0, 1, 1], [], []>} : vector<8x32xf32>, vector<32x64xf32>, vector<8x64xf32> -> vector<8x64xf32>
    %c0_45 = arith.constant 0 : index
    %c0_46 = arith.constant 0 : index
    %c0_47 = arith.constant 0 : index
    %123 = vector.load %arg11[%c0_45, %c0_46, %c0_47] : memref<1x1x64xf32, #tpu.memory_space<vmem>>, vector<1x1x64xf32>
    %124 = vector.shape_cast %123 : vector<1x1x64xf32> to vector<1x64xf32>
    %125 = vector.broadcast %124 : vector<1x64xf32> to vector<8x64xf32>
    %126 = arith.addf %122, %125 : vector<8x64xf32>
    %cst_48 = arith.constant 0.000000e+00 : f32
    %127 = vector.broadcast %cst_48 : f32 to vector<8x64xf32>
    %128 = arith.maximumf %126, %127 : vector<8x64xf32>
    %c0_49 = arith.constant 0 : index
    %c0_50 = arith.constant 0 : index
    %c0_51 = arith.constant 0 : index
    %129 = vector.load %arg9[%c0_49, %c0_50, %c0_51] : memref<1x64x32xf32, #tpu.memory_space<vmem>>, vector<1x64x32xf32>
    %130 = vector.shape_cast %129 : vector<1x64x32xf32> to vector<64x32xf32>
    %cst_52 = arith.constant dense<0.000000e+00> : vector<8x32xf32>
    %131 = tpu.matmul %128, %130, %cst_52 {dimension_numbers = #tpu.dot_dimension_numbers<[1], [0], [0], [1], [0, 0, 1, 1], [], []>} : vector<8x64xf32>, vector<64x32xf32>, vector<8x32xf32> -> vector<8x32xf32>
    %132 = vector.broadcast %10 : vector<1x32xf32> to vector<8x32xf32>
    %133 = arith.addf %131, %132 : vector<8x32xf32>
    %134 = arith.addf %119, %133 : vector<8x32xf32>
    %cst_53 = arith.constant dense<0.000000e+00> : vector<8xf32>
    %135 = vector.multi_reduction <add>, %134, %cst_53 [1] : vector<8x32xf32> to vector<8xf32>
    %136 = vector.shape_cast %135 : vector<8xf32> to vector<8x1xf32>
    %cst_54 = arith.constant 3.200000e+01 : f32
    %137 = vector.broadcast %cst_54 : f32 to vector<8x1xf32>
    %138 = arith.divf %136, %137 : vector<8x1xf32>
    %139 = vector.broadcast %138 : vector<8x1xf32> to vector<8x32xf32>
    %140 = arith.subf %134, %139 : vector<8x32xf32>
    %141 = arith.mulf %140, %140 : vector<8x32xf32>
    %cst_55 = arith.constant dense<0.000000e+00> : vector<8xf32>
    %142 = vector.multi_reduction <add>, %141, %cst_55 [1] : vector<8x32xf32> to vector<8xf32>
    %143 = vector.shape_cast %142 : vector<8xf32> to vector<8x1xf32>
    %cst_56 = arith.constant 3.200000e+01 : f32
    %144 = vector.broadcast %cst_56 : f32 to vector<8x1xf32>
    %145 = arith.divf %143, %144 : vector<8x1xf32>
    %146 = vector.broadcast %138 : vector<8x1xf32> to vector<8x32xf32>
    %147 = arith.subf %134, %146 : vector<8x32xf32>
    %cst_57 = arith.constant 9.99999974E-6 : f32
    %148 = vector.broadcast %cst_57 : f32 to vector<8x1xf32>
    %149 = arith.addf %145, %148 : vector<8x1xf32>
    %150 = math.rsqrt %149 : vector<8x1xf32>
    %151 = vector.broadcast %150 : vector<8x1xf32> to vector<8x32xf32>
    %152 = arith.mulf %147, %151 : vector<8x32xf32>
    %153 = vector.broadcast %11 : vector<1x32xf32> to vector<8x32xf32>
    %154 = arith.mulf %152, %153 : vector<8x32xf32>
    %155 = vector.broadcast %12 : vector<1x32xf32> to vector<8x32xf32>
    %156 = arith.addf %154, %155 : vector<8x32xf32>
    %c0_58 = arith.constant 0 : index
    %c0_59 = arith.constant 0 : index
    %c0_60 = arith.constant 0 : index
    %157 = vector.load %arg12[%c0_58, %c0_59, %c0_60] : memref<1x8x32xf32, #tpu.memory_space<vmem>>, vector<1x8x32xf32>
    %158 = vector.shape_cast %157 : vector<1x8x32xf32> to vector<8x32xf32>
    %159 = vector.shape_cast %156 : vector<8x32xf32> to vector<1x8x32xf32>
    tpu.vector_store %arg12[%c0_58, %c0_59, %c0_60], %159 {strides = array<i32>} : memref<1x8x32xf32, #tpu.memory_space<vmem>>, vector<1x8x32xf32>,
    return
  }
  func.func @transform_0(%arg0: i32, %arg1: i32) -> (i32, i32, i32) {
    %c0_i32 = arith.constant 0 : i32
    %c0_i32_0 = arith.constant 0 : i32
    %c0_i32_1 = arith.constant 0 : i32
    return %arg0, %c0_i32, %c0_i32_0 : i32, i32, i32
  }
  func.func @transform_1(%arg0: i32, %arg1: i32) -> (i32, i32) {
    %c0_i32 = arith.constant 0 : i32
    %c0_i32_0 = arith.constant 0 : i32
    %c0_i32_1 = arith.constant 0 : i32
    return %c0_i32, %c0_i32_0 : i32, i32
  }
  func.func @transform_2(%arg0: i32, %arg1: i32) -> (i32, i32) {
    %c0_i32 = arith.constant 0 : i32
    %c0_i32_0 = arith.constant 0 : i32
    %c0_i32_1 = arith.constant 0 : i32
    return %c0_i32, %c0_i32_0 : i32, i32
  }
  func.func @transform_3(%arg0: i32, %arg1: i32) -> (i32, i32, i32) {
    %c0_i32 = arith.constant 0 : i32
    %c0_i32_0 = arith.constant 0 : i32
    %c0_i32_1 = arith.constant 0 : i32
    return %arg1, %c0_i32, %c0_i32_0 : i32, i32, i32
  }
  func.func @transform_4(%arg0: i32, %arg1: i32) -> (i32, i32, i32) {
    %c0_i32 = arith.constant 0 : i32
    %c0_i32_0 = arith.constant 0 : i32
    %c0_i32_1 = arith.constant 0 : i32
    return %arg1, %c0_i32, %c0_i32_0 : i32, i32, i32
  }
  func.func @transform_5(%arg0: i32, %arg1: i32) -> (i32, i32, i32) {
    %c0_i32 = arith.constant 0 : i32
    %c0_i32_0 = arith.constant 0 : i32
    %c0_i32_1 = arith.constant 0 : i32
    return %arg1, %c0_i32, %c0_i32_0 : i32, i32, i32
  }
  func.func @transform_6(%arg0: i32, %arg1: i32) -> (i32, i32, i32) {
    %c0_i32 = arith.constant 0 : i32
    %c0_i32_0 = arith.constant 0 : i32
    %c0_i32_1 = arith.constant 0 : i32
    return %arg1, %c0_i32, %c0_i32_0 : i32, i32, i32
  }
  func.func @transform_7(%arg0: i32, %arg1: i32) -> (i32, i32, i32) {
    %c0_i32 = arith.constant 0 : i32
    %c0_i32_0 = arith.constant 0 : i32
    %c0_i32_1 = arith.constant 0 : i32
    return %arg1, %c0_i32, %c0_i32_0 : i32, i32, i32
  }
  func.func @transform_8(%arg0: i32, %arg1: i32) -> (i32, i32, i32) {
    %c0_i32 = arith.constant 0 : i32
    %c0_i32_0 = arith.constant 0 : i32
    %c0_i32_1 = arith.constant 0 : i32
    return %arg1, %c0_i32, %c0_i32_0 : i32, i32, i32
  }
  func.func @transform_9(%arg0: i32, %arg1: i32) -> (i32, i32, i32) {
    %c0_i32 = arith.constant 0 : i32
    %c0_i32_0 = arith.constant 0 : i32
    %c0_i32_1 = arith.constant 0 : i32
    return %arg1, %c0_i32, %c0_i32_0 : i32, i32, i32
  }
  func.func @transform_10(%arg0: i32, %arg1: i32) -> (i32, i32, i32) {
    %c0_i32 = arith.constant 0 : i32
    %c0_i32_0 = arith.constant 0 : i32
    %c0_i32_1 = arith.constant 0 : i32
    return %arg0, %c0_i32, %c0_i32_0 : i32, i32, i32
  }
}

</mosaic_0001>

<bundles_post_ra>
// kernel: tpu_custom_call.1
= control target key start
LH: loop header
LB: loop body
LE: loop exit
PB: predicated region body
PF: predicated region fallthrough
CT: control target
= control target key end

     0   :  { %s2951_s0 = inlined_call_operand.vmem [shape: f32[2,8,4], index: 0, kind: input, shape index: {}]   ;;  %s2952_s1 = inlined_call_operand.vmem [shape: f32[4,32], index: 1, kind: input, shape index: {}]   ;;  %s2953_s2 = inlined_call_operand.hbm [shape: f32[8,32], index: 2, kind: input, shape index: {}]   ;;  %s2954_s3 = inlined_call_operand.vmem [shape: f32[2,32,96], index: 3, kind: input, shape index: {}]   ;;  %s2955_s4 = inlined_call_operand.vmem [shape: f32[2,1,96], index: 4, kind: input, shape index: {}]   ;;  %s2956_s5 = inlined_call_operand.vmem [shape: f32[2,32,32], index: 5, kind: input, shape index: {}]   ;;  %s2957_s6 = inlined_call_operand.vmem [shape: f32[2,32,64], index: 6, kind: input, shape index: {}]   ;;  %s2958_s7 = inlined_call_operand.vmem [shape: f32[2,64,32], index: 7, kind: input, shape index: {}]   ;;  %s2959_s8 = inlined_call_operand.vmem [shape: f32[2,6,32], index: 8, kind: input, shape index: {}]   ;;  %s2960_s9 = inlined_call_operand.vmem [shape: f32[2,1,64], index: 9, kind: input, shape index: {}]   ;;  %s2961_s10 = inlined_call_operand.hbm [shape: f32[2,8,32], index: 10, kind: output, shape index: {}]  }
   0x1   :  { %2976 = sst [smem:[#allocation17_spill]] %s2951_s0 }
   0x2   :  { %2977 = sst [smem:[#allocation18_spill]] %s2953_s2 }
   0x3   :  { %2978 = sst [smem:[#allocation19_spill]] %s2954_s3 }
   0x4   :  { %2979 = sst [smem:[#allocation20_spill]] %s2956_s5 }
   0x5   :  { %2980 = sst [smem:[#allocation21_spill]] %s2961_s10 }
   0x6   :  { %15 = vsyncpa [#allocation3], 0 }
   0x7   :  { %16 = vsyncpa [#allocation4], 0 }
   0x8   :  { %18 = vsyncpa [#allocation4 + $0x1], 0  ;;  %s2581_s13 = smov 0   ;;  %s2583_s14 = smov 0  }
   0x9   :  { %s2585_s15 = smov 0   ;;  %s2587_s16 = smov 0  }
   0xa   :  { %s2589_s17 = smov 0   ;;  %s2591_s18 = smov 0  }
   0xb   :  { %s2593_s19 = smov 0   ;;  %s2595_s20 = smov 0  }
   0xc LB: > { %2981 = sst [smem:[#allocation8_spill]] %s2478_s13  ;;  %s2037_s21 = sadd.s32 4294967295, %s2506_s20   ;;  %s2506_s20 = sphi %s2595_s20, %s24_s20   ;;  %s2502_s19 = sphi %s2593_s19, %s3014_s19   ;;  %s2498_s18 = sphi %s2591_s18, %s3013_s18   ;;  %s2494_s17 = sphi %s2589_s17, %s3012_s17   ;;  %s2490_s16 = sphi %s2587_s16, %s3011_s16   ;;  %s2486_s15 = sphi %s2585_s15, %s3017_s15   ;;  %s2482_s14 = sphi %s2583_s14, %s3016_s14   ;;  %s2478_s13 = sphi %s2581_s13, %s3015_s13  }
   0xd   : > { %2982 = sst [smem:[#allocation9_spill]] %s2486_s15  ;;  %s2038_s22 = sadd.s32 4294967294, %s2506_s20  }
   0xe   : > { %2983 = sst [smem:[#allocation10_spill]] %s2498_s18  ;;  %s33_s23 = sadd.s32 1, %s2498_s18 }
   0xf   : > { %2984 = sst [smem:[#allocation11_spill]] %s2502_s19  ;;  %s36_s24 = sadd.s32 1, %s2502_s19 }
  0x10   : > { %2985 = sst [smem:[#allocation12_spill]] %s2506_s20  ;;  %p34_p0 = scmp.ge.s32.totalorder %s33_s23, 2 }
  0x11   : > { %s293_s25 = sadd.s32 1, %s2486_s15  ;;  %p303_p1 = scmp.ne.s32.totalorder %s2486_s15, %s2482_s14 }
  0x12   : > { %p304_p2 = scmp.eq.s32.totalorder %s2037_s21, 3  ;;  %s3019_s23 = smov (%p34_p0, %s33_s23), 0 }
  0x13   : > { %2986 = sst [smem:[#allocation13_spill]] %s3019_s23  ;;  %s3021_s24 = smov (!%p34_p0, %s36_s24), %s2502_s19 }
  0x14   : > { %p2631_p3 = por %p304_p2, %p303_p1  ;;  %p309_p4 = scmp.ne.s32.totalorder %s2482_s14, %s2478_s13 }
  0x15   : > { %p38_p5 = scmp.ge.s32.totalorder %s3021_s24, 2  ;;  %p310_p6 = scmp.eq.s32.totalorder %s2038_s22, 3 }
  0x16   : > { %s2987_s26 = scalar_select %p2631_p3, 1, 0 }
  0x17   : > { %p2039_p7 = scmp.ge.s32.totalorder %s2506_s20, 1  ;;  %p317_p8 = scmp.lt.s32.totalorder %s2506_s20, 5 }
  0x18   : > { %s3023_s24 = smov (%p38_p5, %s3021_s24), 0  ;;  %p2641_p9 = por %p310_p6, %p309_p4 }
  0x19   : > { %2988 = sst [smem:[#allocation14_spill]] %s3023_s24  ;;  %p2645_p10 = pnand %p2039_p7, %p317_p8 }
  0x1a   : > { %s2989_s27 = scalar_select %p2641_p9, 1, 0 }
  0x1b   : > { %s2991_s28 = scalar_select %p2645_p10, 1, 0 }
  0x1c   : > { %2990 = sst [smem:[#allocation15_spill]] %s2989_s27  ;;  %s290_s29 = ssub.s32 %s2502_s19, %s3023_s24 }
  0x1d   : > { %p291_p11 = scmp.eq.s32.totalorder %s290_s29, 0  ;;  %p2268_p12 = pneg %p2645_p10 }
  0x1e   : > { %p2653_p13 = scmp.eq.s32.totalorder %s2037_s21, 0  ;;  %s2508_s12 = smov [#allocation2]  }
  0x1f   : > { %s2658_s11 = scalar_select %p291_p11, %s2486_s15, %s293_s25  }
  0x20   : > { %s2992_s30 = scalar_select %p2653_p13, 1, 0 }
  0x21   : > { %2993 = sst [smem:[#allocation16_spill]] %s2658_s11  ;;  %s333_s22 = sshll.u32 %s2508_s12, 4  ;;  %s334_s22 = int_to_ptr.vmem [resolvable:$true] %s333_s22 }
  0x22   : > { %p2662_p0 = pnand %p2653_p13, %p2268_p12  ;;  %s2995_s2 = sld [smem:[#allocation18_spill]] }
  0x24   : > { %p2382_p2 = pneg %p2662_p0 }
  0x28   : > { %s2380_s19 = scalar_lea.hbm %s2995_s2, 128 }
  0x29   : > { %p2381_p1 = scmp.ne.s32.totalorder %s2995_s2, %s2380_s19  ;;  %p2387_p6 = scmp.lt.u32.totalorder %s2380_s19, %s2995_s2 }
  0x2b   : > { %p2383_p4 = pnand %p2382_p2, %p2381_p1 }
  0x2d   : > { %p2384_p5 = pneg %p2383_p4 }
  0x2f   : > { %p2389_p7 = pnand %p2387_p6, %p2384_p5 }
  0x31   : > { %2392 = shalt.err (!%p2389_p7)
}
  0x32   : > { %s2393_s11 = scalar_lea.vmem %s334_s22, 128  ;;  %p2401_p9 = scmp.lt.s32.totalorder %s334_s22, %s334_s22 }
  0x33   : > { %p2394_p8 = scmp.ne.s32.totalorder %s334_s22, %s2393_s11  ;;  %p2402_p3 = scmp.lt.s32.totalorder %s2393_s11, %s2393_s11 }
  0x35   : > { %p2396_p11 = pnand %p2394_p8, %p2382_p2  ;;  %p2403_p13 = por %p2402_p3, %p2401_p9 }
  0x37   : > { %p2397_p12 = pneg %p2396_p11 }
  0x39   : > { %p2404_p10 = pnand %p2403_p13, %p2397_p12 }
  0x3b   : > { %2407 = shalt.err (!%p2404_p10)
}
  0x3c   : > { %2271 = dma.hbm_to_vmem [thread:$0]  (!%p2662_p0), %s2995_s2, 128, %s334_s22, [#allocation3]  }
  0x3d   : > { %p2996_p1 = scmp.ne.s32.totalorder %s2991_s28, 0 }
  0x3e   : > { %p2997_p4 = scmp.ne.s32.totalorder (!%p2996_p1), %s2992_s30, 0 }
  0x3f   : > { %404 = sbr.rel (%p2996_p1) target bundleno = 3944 (0xf68), region = 60 }
  0x46   : > { %2469 = dma.done.wait (%p2997_p4), [#allocation3], 128  }
  0x47   : > { %2471 = vsyncadd (%p2997_p4), [#allocation3], 4294967168  ;;  %s2969_s19 = sand.u32 1, %s2482_s14   ;;  %p471_p3 = scmp.lt.s32.totalorder %s2494_s17, 1 }
  0x48   : > { %s2044_s23 = sshll.u32 %s2969_s19, 3  ;;  %p475_p9 = scmp.lt.s32.totalorder %s2490_s16, 1 }
  0x49   : > { %s472_s11 = scalar_select %p471_p3, %s2494_s17, 1 }
  0x4a   : > { %s2695_s28 = scalar_select %p475_p9, %s2490_s16, 1 }
  0x4b   : > { %s2045_s30 = sshll.u32 %s472_s11, 3  ;;  %s2998_s0 = sld [smem:[#allocation17_spill]] }
  0x4c   : > { %s2083_s25 = sshll.u32 %s2695_s28, 5  ;;  %s2999_s3 = sld [smem:[#allocation19_spill]] }
  0x4d   : > { %s3000_s5 = sld [smem:[#allocation20_spill]]  ;;  %s2718_s22 = scalar_lea.vmem %s2957_s6, %s2083_s25 }
  0x4e   : > { %s2054_s29 = sshll.u32 %s2695_s28, 3  ;;  %s504_s15 = scalar_lea.vmem %s2960_s9, %s2695_s28 }
  0x4f   : > { %s2730_s19 = scalar_lea.vmem %s2959_s8, %s2054_s29  ;;  %p2055_p10 = scmp.ne.s32.totalorder %s2490_s16, 0 }
  0x50   : > { %v510_v0 = vld [vmem:[%s2952_s1] sm:$0xf] (!%p2055_p10)  ;;  %vm516_vm0 = vcmask (!%p2055_p10), 1043456   ;;  %v2509_v2 = vmov (!%p2055_p10), 0.0   ;;  %vm2510_vm1 = vmmov (!%p2055_p10), 0   ;;  %vm512_vm2 = vcmask (!%p2055_p10), 31744  }
  0x51   : > { %s474_s21 = scalar_lea.vmem %s2998_s0, %s2045_s30  ;;  %s2086_s30 = sshll.u32 %s2695_s28, 6  ;;  %2132 = vmatprep.subr.mxu0 (!%p2055_p10), %v2509_v2  ;;  %2134 = vmatprep.mubr.msk.f32.mxu0 (!%p2055_p10), %vm2510_vm1, %v2509_v2  ;;  %v511_v3 = vld [vmem:[#allocation2] sm:$0xff] (!%p2055_p10)  ;;  %vm590_vm3 = vcmask (!%p2055_p10), 261120  }
  0x52   : > { %s2704_s24 = scalar_lea.vmem %s2999_s3, %s2083_s25  ;;  %s2725_s18 = scalar_lea.vmem %s2958_s7, %s2086_s30  ;;  %v509_v1 = vld [vmem:[%s474_s21] sm:$0xff] (!%p2055_p10)  ;;  %2133 = vmatpush3.msk.msra.mxu0 (!%p2055_p10), %vm516_vm0, %v510_v0 }
  0x53   : > { %s2713_s20 = scalar_lea.vmem %s3000_s5, %s2083_s25  ;;  %s2736_s5 = scalar_lea.vmem [#allocation5], %s2044_s23  ;;  %2135 = vmatmul.mubr.msk.f32.vlgmr.msra.gmra.mrb[0].mxu0 (!%p2055_p10), %vm512_vm2, %v509_v1 }
  0x54   : > { %508 = sbr.rel (%p2055_p10) target bundleno = 298 (0x12a), region = 68 }
 0x126   : > { %v586_v4 = vpop.f32.mrb[0].mxu0 }
 0x127   : > { %v587_v5 = vadd.f32 %v586_v4, %v511_v3  ;;  %v2136_v6 = vpop.f32.mrb[1].mxu0 }
 0x129   : > { %591 = vst.msk [vmem:[%s2736_s5] sm:$0xff] %vm590_vm3, %v587_v5 }
 0x12a PF: > { %v594_v7 = vld [vmem:[%s2704_s24] sm:$0xff]  ;;  %v595_v8 = vld [vmem:[%s2704_s24 + $0x8] sm:$0xff]  ;;  %v596_v9 = vld [vmem:[%s2704_s24 + $0x10] sm:$0xff]  ;;  %v2511_v10 = vmov 0.0|0.0   ;;  %vm2512_vm4 = vmmov 0   ;;  %v2513_v13 = vmov 0.0   ;;  %s3001_s16 = scalar_lea.vmem %s2955_s4, %s2695_s28 }
 0x12b   : > { %2238 = vmatprep.subr.bf16.mxu0 %v2511_v10  ;;  %v2239_v11 = vpack.c.bf16 %v595_v8, %v594_v7  ;;  %v597_v12 = vld [vmem:[%s2704_s24 + $0x18] sm:$0xff]  ;;  %2145 = vmatprep.mubr.msk.f32.mxu0 %vm2512_vm4, %v2513_v13  ;;  %vm605_vm5 = vcmask 261120   ;;  %v2058_v16 = vld [vmem:[%s3001_s16] ss:$0 sm:$0xff]  ;;  %s2514_s23 = smov 120   ;;  %s2515_s21 = smov 96  }
 0x12c   : > { %2153 = vmatprep.subr.mxu1 %v2513_v13  ;;  %2155 = vmatprep.mubr.msk.f32.mxu1 %vm2512_vm4, %v2513_v13  ;;  %v2242_v14 = vpack.c.bf16 %v597_v12, %v596_v9  ;;  %s2516_s24 = smov 88   ;;  %vm686_vm6 = vcmask 64512   ;;  %s2517_s11 = smov 56   ;;  %v680_v39 = vld [vmem:[%s2713_s20 + $0x8] sm:$0xff]  ;;  %v679_v48 = vld [vmem:[%s2713_s20] sm:$0xff]  ;;  %vm1764_vm7 = vcmask 523264  }
 0x12d   : > { %2240 = vmatpush3.bf16.msra.mxu0 %v2239_v11  ;;  %s2518_s30 = smov 64   ;;  %s2519_s29 = smov 80   ;;  %v681_v11 = vld [vmem:[%s2713_s20 + $0x10] sm:$0xff] }
 0x12e   : > { %2241 = vmatprep.subr.bf16.mxu0 %v2511_v10  ;;  %s2520_s12 = smov 112   ;;  %s2521_s2 = smov 72  }
 0x12f   : > { %s2522_s13 = smov 104   ;;  %s2523_s27 = smov 48  }
 0x130   : > { %v2755_v15 = vld [vmem:[%s2736_s5] sm:$0xff]  ;;  %s2524_s10 = smov 40   ;;  %s1877_s28 = sshll.u32 %s2736_s5, 4  ;;  %s2896_s28 = int_to_ptr.vmem [resolvable:$true] %s1877_s28 }
 0x131   : > { %2243 = vmatpush3.bf16.msra.mxu0 %v2242_v14  ;;  %s3002_s25 = sld [smem:[#allocation21_spill]]  ;;  %s3003_s3 = sand.u32 1, %s2482_s14  }
 0x132   : > { %2148 = vmatprep.subr.mxu0 %v2513_v13  ;;  %s1864_s16 = scalar_lea.sflag [#allocation4], %s3003_s3  ;;  %p3004_p0 = scmp.ne.s32.totalorder %s2987_s26, 0 }
 0x134   : > { %2146 = vmatmul.mubr.msk.f32.vlgmr.msra.gmra.mrb[0].mxu0 %vm605_vm5, %v2755_v15 }
 0x135   : > { %2150 = vmatprep.mubr.msk.f32.mxu0 %vm2512_vm4, %v2513_v13 }
 0x207   : > { %v675_v17 = vpop.f32.mrb[0].mxu0 }
 0x208   : > { %v2767_v18 = vadd.f32 %v2058_v16, %v675_v17  ;;  %v2147_v19 = vpop.f32.mrb[1].mxu0 }
 0x20a   : > { %848 = vrot.lane.b32.xlu1 %v2767_v18, %s2514_s23  ;;  %684 = vrot.lane.b32.xlu0 %v2767_v18, %s2515_s21  ;;  %s2408_s23 = scalar_lea.vmem %s2896_s28, 128 }
 0x20b   : > { %p2409_p13 = scmp.ne.s32.totalorder %s2896_s28, %s2408_s23 }
 0x20d   : > { %p2410_p2 = pnand %p2409_p13, %p3004_p0 }
 0x20e   : > { %850 = vrot.lane.b32.xlu0 %v2767_v18, %s2516_s24 }
 0x20f   : > { %p2411_p5 = pneg %p2410_p2 }
 0x27c   : > { %v685_v20 = vpop.permute.xlu0 %684  ;;  %v849_v22 = vpop.permute.xlu1 %848 }
 0x27d   : > { %2149 = vmatpush3.xpose.msk.msra.mxu0 %vm686_vm6, %v685_v20 }
 0x27e   : > { %2158 = vmatprep.subr.mxu0 %v2513_v13 }
 0x280   : > { %2151 = vmatmul.mubr.msk.f32.vlgmr.msra.gmra.mrb[2].mxu0 %vm686_vm6, %v2767_v18  ;;  %v851_v21 = vpop.permute.xlu0 %850 }
 0x281   : > { %2159 = vmatpush3.xpose.msk.msra.mxu0 %vm686_vm6, %v851_v21  ;;  %2160 = vmatprep.mubr.msk.f32.mxu0 %vm2512_vm4, %v2513_v13 }
 0x282   : > { %2168 = vmatprep.subr.mxu0 %v2513_v13 }
 0x284   : > { %2161 = vmatmul.mubr.msk.f32.vlgmr.msra.gmra.mrb[4].mxu0 %vm686_vm6, %v849_v22 }
 0x285   : > { %2170 = vmatprep.mubr.msk.f32.mxu0 %vm2512_vm4, %v2513_v13  ;;  %2169 = vmatpush3.msra.mxu0 %v680_v39 }
 0x286   : > { %2178 = vmatprep.subr.mxu0 %v2513_v13 }
 0x353   : > { %v757_v23 = vpop.f32.mrb[2].mxu0 }
 0x354   : > { %v2152_v24 = vpop.f32.mrb[3].mxu0  ;;  %v761_v25 = vsel %vm686_vm6, %v757_v23, -inf }
 0x355   : > { %762 = vmax.xlane.f32.xlu1 %v761_v25 }
 0x357   : > { %v922_v26 = vpop.f32.mrb[4].mxu0 }
 0x358   : > { %v2162_v27 = vpop.f32.mrb[5].mxu0  ;;  %v926_v28 = vsel %vm686_vm6, %v922_v26, -inf }
 0x359   : > { %927 = vmax.xlane.f32.xlu0 %v926_v28 }
 0x3e2   : > { %v763_v29 = vpop.xlane.xlu1 %762 }
 0x3e3   : > { %v764_v30 = vsub.f32 %v757_v23, %v763_v29 }
 0x3e5   : > { %v765_v31 = vmul.f32 1.442695, %v764_v30 }
 0x3e6   : > { %v928_v32 = vpop.xlane.xlu0 %927 }
 0x3e7   : > { %2360 = vpow2.f32 %v765_v31  ;;  %v929_v33 = vsub.f32 %v922_v26, %v928_v32  ;;  %v682_v26 = vld [vmem:[%s2713_s20 + $0x18] sm:$0xff] }
 0x3e9   : > { %v930_v34 = vmul.f32 1.442695, %v929_v33 }
 0x3eb   : > { %2362 = vpow2.f32 %v930_v34  ;;  %v1637_v34 = vlaneseq }
 0x3f1   : > { %v2361_v35 = vpop.eup %2360 }
 0x3f2   : > { %v767_v36 = vsel %vm686_vm6, %v2361_v35, 0.0 }
 0x3f3   : > { %768 = vadd.xlane.f32.xlu0 %v767_v36 }
 0x3f5   : > { %v2363_v37 = vpop.eup %2362 }
 0x3f6   : > { %v932_v38 = vsel %vm686_vm6, %v2363_v37, 0.0 }
 0x3f7   : > { %933 = vadd.xlane.f32.xlu1 %v932_v38 }
 0x408   : > { %937 = vrot.lane.b32.xlu1 %v2767_v18, %s2517_s11 }
 0x409   : > { %772 = vrot.lane.b32.xlu0 %v2767_v18, %s2518_s30 }
 0x40c   : > { %1161 = vrot.lane.b32.xlu1 %v2767_v18, %s2519_s29 }
 0x40d   : > { %1159 = vrot.lane.b32.xlu0 %v2767_v18, %s2520_s12 }
 0x480   : > { %v769_v40 = vpop.xlane.xlu0 %768 }
 0x481   : > { %2364 = vrcp.f32 %v769_v40 }
 0x484   : > { %v934_v41 = vpop.xlane.xlu1 %933  ;;  %v773_v42 = vpop.permute.xlu0 %772 }
 0x485   : > { %2366 = vrcp.f32 %v934_v41  ;;  %2154 = vmatpush3.msra.mxu1 %v773_v42 }
 0x486   : > { %2163 = vmatprep.subr.mxu1 %v2513_v13 }
 0x488   : > { %v938_v45 = vpop.permute.xlu1 %937  ;;  %v1160_v54 = vpop.permute.xlu0 %1159 }
 0x48b   : > { %v2365_v43 = vpop.eup %2364 }
 0x48c   : > { %v771_v44 = vmul.f32 %v2365_v43, %v2361_v35  ;;  %v1162_v52 = vpop.permute.xlu1 %1161  ;;  %v2845_v35 = vshrl.u32 %v1637_v34, 7 }
 0x48e   : > { %2156 = vmatmul.mubr.msk.f32.vlgmr.msra.gmra.mrb[0].mxu1 %vm686_vm6, %v771_v44  ;;  %v1639_v36 = vsub.s32 0, %v2845_v35 }
 0x48f   : > { %v2367_v46 = vpop.eup %2366  ;;  %2164 = vmatpush3.msra.mxu1 %v938_v45  ;;  %2165 = vmatprep.mubr.msk.f32.mxu1 %vm2512_vm4, %v2513_v13 }
 0x490   : > { %v936_v47 = vmul.f32 %v2367_v46, %v2363_v37  ;;  %2173 = vmatprep.subr.mxu1 %v2513_v13  ;;  %v2849_v37 = vld [vmem:[%s2730_s19] sm:$0x3f] }
 0x491   : > { %v1640_v38 = vrot.slane %v2849_v37, %v1639_v36  ;;  %v1854_v36 = vsub.s32 4, %v2845_v35 }
 0x492   : > { %2166 = vmatmul.mubr.msk.f32.vlgmr.msra.gmra.mrb[2].mxu1 %vm686_vm6, %v936_v47 }
 0x493   : > { %2175 = vmatprep.mubr.msk.f32.mxu1 %vm2512_vm4, %v2513_v13  ;;  %2174 = vmatpush3.msra.mxu1 %v679_v48 }
 0x494   : > { %2183 = vmatprep.subr.mxu1 %v2513_v13 }
 0x561   : > { %v844_v49 = vpop.f32.mrb[0].mxu1 }
 0x562   : > { %v2157_v50 = vpop.f32.mrb[1].mxu1  ;;  %2176 = vmatmul.mubr.msk.f32.vlgmr.msra.gmra.mrb[4].mxu1 %vm686_vm6, %v844_v49  ;;  %v1667_v49 = vld [vmem:[%s2718_s22] sm:$0xff] }
 0x563   : > { %2185 = vmatprep.mubr.msk.f32.mxu1 %vm2512_vm4, %v2513_v13  ;;  %v1668_v50 = vld [vmem:[%s2718_s22 + $0x8] sm:$0xff] }
 0x565   : > { %v1009_v51 = vpop.f32.mrb[2].mxu1 }
 0x566   : > { %v2167_v53 = vpop.f32.mrb[3].mxu1  ;;  %2171 = vmatmul.mubr.msk.f32.vlgmr.msra.gmra.mrb[6].mxu0 %vm686_vm6, %v1009_v51  ;;  %v2245_v51 = vpack.c.bf16 %v1668_v50, %v1667_v49 }
 0x567   : > { %2179 = vmatpush3.xpose.msk.msra.mxu0 %vm686_vm6, %v1162_v52  ;;  %2180 = vmatprep.mubr.msk.f32.mxu0 %vm2512_vm4, %v2513_v13  ;;  %v1670_v52 = vld [vmem:[%s2718_s22 + $0x18] sm:$0xff] }
 0x568   : > { %2188 = vmatprep.subr.mxu0 %v2513_v13 }
 0x56a   : > { %2181 = vmatmul.mubr.msk.f32.vlgmr.msra.gmra.mrb[8].mxu0 %vm686_vm6, %v1160_v54  ;;  %v1752_v54 = vld [vmem:[%s2725_s18] sm:$0xff] }
 0x56b   : > { %2190 = vmatprep.mubr.msk.f32.mxu0 %vm2512_vm4, %v2513_v13  ;;  %2189 = vmatpush3.msra.mxu0 %v681_v11  ;;  %v1759_v11 = vld [vmem:[%s2725_s18 + $0x38] sm:$0xff] }
 0x56c   : > { %2198 = vmatprep.subr.mxu0 %v2513_v13 }
 0x635   : > { %v1155_v55 = vpop.f32.mrb[4].mxu1 }
 0x636   : > { %v2177_v56 = vpop.f32.mrb[5].mxu1 }
 0x637   : > { %v1754_v56 = vld [vmem:[%s2725_s18 + $0x10] sm:$0xff] }
 0x639   : > { %v1082_v57 = vpop.f32.mrb[6].mxu0 }
 0x63a   : > { %v1156_v58 = vadd.f32 %v1155_v55, %v1082_v57  ;;  %v2172_v59 = vpop.f32.mrb[7].mxu0  ;;  %v1753_v55 = vld [vmem:[%s2725_s18 + $0x8] sm:$0xff] }
 0x63b   : > { %v2251_v57 = vpack.c.bf16 %v1753_v55, %v1752_v54 }
 0x63d   : > { %v1233_v60 = vpop.f32.mrb[8].mxu0 }
 0x63e   : > { %v2182_v61 = vpop.f32.mrb[9].mxu0  ;;  %v1237_v62 = vsel %vm686_vm6, %v1233_v60, -inf }
 0x63f   : > { %1238 = vmax.xlane.f32.xlu1 %v1237_v62  ;;  %v1757_v61 = vld [vmem:[%s2725_s18 + $0x28] sm:$0xff] }
 0x650   : > { %1400 = vrot.lane.b32.xlu1 %v2767_v18, %s2521_s2 }
 0x654   : > { %1398 = vrot.lane.b32.xlu1 %v2767_v18, %s2522_s13 }
 0x6cc   : > { %v1239_v63 = vpop.xlane.xlu1 %1238 }
 0x6cd   : > { %v1240_v0 = vsub.f32 %v1233_v60, %v1239_v63  ;;  %v1756_v60 = vld [vmem:[%s2725_s18 + $0x20] sm:$0xff] }
 0x6ce   : > { %v2257_v62 = vpack.c.bf16 %v1757_v61, %v1756_v60 }
 0x6cf   : > { %v1241_v1 = vmul.f32 1.442695, %v1240_v0 }
 0x6d0   : > { %v1401_v7 = vpop.permute.xlu1 %1400 }
 0x6d1   : > { %2368 = vpow2.f32 %v1241_v1 }
 0x6d4   : > { %v1399_v9 = vpop.permute.xlu1 %1398 }
 0x6db   : > { %v2369_v2 = vpop.eup %2368 }
 0x6dc   : > { %v1243_v3 = vsel %vm686_vm6, %v2369_v2, 0.0 }
 0x6dd   : > { %1244 = vadd.xlane.f32.xlu0 %v1243_v3  ;;  %v1664_v3 = vsub.s32 2, %v2845_v35 }
 0x6f3   : > { %1248 = vrot.lane.b32.xlu0 %v2767_v18, %s2523_s27 }
 0x76a   : > { %v1245_v4 = vpop.xlane.xlu0 %1244 }
 0x76b   : > { %2370 = vrcp.f32 %v1245_v4 }
 0x76e   : > { %v1249_v5 = vpop.permute.xlu0 %1248 }
 0x76f   : > { %2184 = vmatpush3.msra.mxu1 %v1249_v5 }
 0x770   : > { %2193 = vmatprep.subr.mxu1 %v2513_v13 }
 0x775   : > { %v2371_v6 = vpop.eup %2370 }
 0x776   : > { %v1247_v8 = vmul.f32 %v2371_v6, %v2369_v2  ;;  %v1659_v2 = vsub.s32 1, %v2845_v35 }
 0x778   : > { %2186 = vmatmul.mubr.msk.f32.vlgmr.msra.gmra.mrb[6].mxu1 %vm686_vm6, %v1247_v8  ;;  %v1660_v4 = vrot.slane %v2849_v37, %v1659_v2 }
 0x779   : > { %2194 = vmatpush3.xpose.msk.msra.mxu1 %vm686_vm6, %v1401_v7  ;;  %2195 = vmatprep.mubr.msk.f32.mxu1 %vm2512_vm4, %v2513_v13  ;;  %v1665_v7 = vrot.slane %v2849_v37, %v1664_v3 }
 0x77a   : > { %2203 = vmatprep.subr.mxu1 %v2513_v13 }
 0x77c   : > { %2196 = vmatmul.mubr.msk.f32.vlgmr.msra.gmra.mrb[8].mxu1 %vm686_vm6, %v1399_v9 }
 0x77d   : > { %2205 = vmatprep.mubr.msk.f32.mxu1 %vm2512_vm4, %v2513_v13  ;;  %2204 = vmatpush3.msra.mxu1 %v682_v26 }
 0x77e   : > { %2250 = vmatprep.subr.bf16.mxu1 %v2511_v10 }
 0x84b   : > { %v1320_v12 = vpop.f32.mrb[6].mxu1 }
 0x84c   : > { %v2187_v14 = vpop.f32.mrb[7].mxu1  ;;  %2191 = vmatmul.mubr.msk.f32.vlgmr.msra.gmra.mrb[10].mxu0 %vm686_vm6, %v1320_v12 }
 0x84d   : > { %2200 = vmatprep.mubr.msk.f32.mxu0 %vm2512_vm4, %v2513_v13  ;;  %v2076_v14 = vld [vmem:[%s504_s15] ss:$0 sm:$0xff]  ;;  %s2080_s15 = sshll.u32 %s2494_s17, 7  ;;  %s2525_s17 = smov [#allocation5]  }
 0x84e   : > { %s2894_s0 = scalar_lea.hbm %s3002_s25, %s2080_s15  ;;  %s2412_s21 = sshll.u32 %s2525_s17, 4  ;;  %s2413_s21 = int_to_ptr.vmem [resolvable:$false] %s2412_s21 }
 0x84f   : > { %v1472_v16 = vpop.f32.mrb[8].mxu1  ;;  %s2414_s24 = scalar_lea.vmem %s2413_s21, 256  ;;  %p2415_p6 = scmp.lt.s32.totalorder %s2896_s28, %s2413_s21 }
 0x850   : > { %v2197_v17 = vpop.f32.mrb[9].mxu1  ;;  %v1476_v19 = vsel %vm686_vm6, %v1472_v16, -inf  ;;  %p2416_p7 = scmp.lt.s32.totalorder %s2414_s24, %s2408_s23 }
 0x851   : > { %1477 = vmax.xlane.f32.xlu0 %v1476_v19 }
 0x852   : > { %p2417_p8 = por %p2416_p7, %p2415_p6 }
 0x854   : > { %p2418_p11 = pnand %p2417_p8, %p2411_p5 }
 0x867   : > { %1487 = vrot.lane.b32.xlu0 %v2767_v18, %s2524_s10 }
 0x8de   : > { %v1478_v20 = vpop.xlane.xlu0 %1477 }
 0x8df   : > { %v1479_v21 = vsub.f32 %v1472_v16, %v1478_v20 }
 0x8e1   : > { %v1480_v22 = vmul.f32 1.442695, %v1479_v21  ;;  %v1762_v21 = vsub.s32 3, %v2845_v35 }
 0x8e2   : > { %v1488_v23 = vpop.permute.xlu0 %1487 }
 0x8e3   : > { %2372 = vpow2.f32 %v1480_v22  ;;  %2199 = vmatpush3.msra.mxu0 %v1488_v23  ;;  %v1763_v22 = vrot.slane %v2849_v37, %v1762_v21 }
 0x8e4   : > { %2244 = vmatprep.subr.bf16.mxu0 %v2511_v10 }
 0x8ed   : > { %v2373_v24 = vpop.eup %2372 }
 0x8ee   : > { %v1482_v25 = vsel %vm686_vm6, %v2373_v24, 0.0 }
 0x8ef   : > { %1483 = vadd.xlane.f32.xlu1 %v1482_v25 }
 0x91f   : > { %v1393_v27 = vpop.f32.mrb[10].mxu0 }
 0x920   : > { %v1397_v28 = vadd.f32 %v1393_v27, %v1156_v58  ;;  %v2192_v18 = vpop.f32.mrb[11].mxu0  ;;  %v1755_v58 = vld [vmem:[%s2725_s18 + $0x18] sm:$0xff] }
 0x921   : > { %v2254_v59 = vpack.c.bf16 %v1755_v58, %v1754_v56 }
 0x97c   : > { %v1484_v29 = vpop.xlane.xlu1 %1483 }
 0x97d   : > { %2374 = vrcp.f32 %v1484_v29 }
 0x987   : > { %v2375_v30 = vpop.eup %2374 }
 0x988   : > { %v1486_v31 = vmul.f32 %v2375_v30, %v2373_v24 }
 0x98a   : > { %2201 = vmatmul.mubr.msk.f32.vlgmr.msra.gmra.mrb[12].mxu0 %vm686_vm6, %v1486_v31 }
 0x98b   : > { %2216 = vmatprep.mubr.msk.f32.mxu0 %vm2512_vm4, %v2513_v13  ;;  %2246 = vmatpush3.bf16.msra.mxu0 %v2245_v51 }
 0x98c   : > { %2247 = vmatprep.subr.bf16.mxu0 %v2511_v10 }
 0xa5d   : > { %v1559_v32 = vpop.f32.mrb[12].mxu0 }
 0xa5e   : > { %v2202_v33 = vpop.f32.mrb[13].mxu0  ;;  %2206 = vmatmul.mubr.msk.f32.vlgmr.msra.gmra.mrb[10].mxu1 %vm686_vm6, %v1559_v32 }
 0xa5f   : > { %2235 = vmatprep.mubr.msk.f32.mxu1 %vm2512_vm4, %v2513_v13  ;;  %2252 = vmatpush3.bf16.msra.mxu1 %v2251_v57 }
 0xa60   : > { %2253 = vmatprep.subr.bf16.mxu1 %v2511_v10 }
 0xa63   : > { %2255 = vmatpush3.bf16.msra.mxu1 %v2254_v59 }
 0xa64   : > { %2256 = vmatprep.subr.bf16.mxu1 %v2511_v10 }
 0xa67   : > { %2258 = vmatpush3.bf16.msra.mxu1 %v2257_v62 }
 0xa68   : > { %2259 = vmatprep.subr.bf16.mxu1 %v2511_v10  ;;  %v1758_v10 = vld [vmem:[%s2725_s18 + $0x30] sm:$0xff] }
 0xa69   : > { %v2260_v12 = vpack.c.bf16 %v1759_v11, %v1758_v10 }
 0xa6b   : > { %2261 = vmatpush3.bf16.msra.mxu1 %v2260_v12 }
 0xb31   : > { %v1632_v39 = vpop.f32.mrb[10].mxu1 }
 0xb32   : > { %v1636_v40 = vadd.f32 %v1632_v39, %v1397_v28  ;;  %v2207_v41 = vpop.f32.mrb[11].mxu1  ;;  %v1855_v39 = vrot.slane %v2849_v37, %v1854_v36 }
 0xb34   : > { %v1641_v42 = vadd.f32 %v1640_v38, %v1636_v40  ;;  %v1859_v38 = vsub.s32 5, %v2845_v35 }
 0xb36   : > { %v1642_v43 = vadd.f32 %v1641_v42, %v2755_v15  ;;  %v1669_v15 = vld [vmem:[%s2718_s22 + $0x10] sm:$0xff]  ;;  %v1860_v42 = vrot.slane %v2849_v37, %v1859_v38 }
 0xb37   : > { %v2248_v53 = vpack.c.bf16 %v1670_v52, %v1669_v15 }
 0xb38   : > { %v1643_v13 = vsel %vm605_vm5, %v1642_v43, 0.0 }
 0xb39   : > { %1644 = vadd.xlane.f32.xlu1 %v1643_v13  ;;  %2249 = vmatpush3.bf16.msra.mxu0 %v2248_v53 }
 0xbc6   : > { %v1645_v44 = vpop.xlane.xlu1 %1644 }
 0xbc7   : > { %v1647_v45 = vmul.f32 0.03125, %v1645_v44 }
 0xbc9   : > { %v1648_v46 = vsub.f32 %v1642_v43, %v1647_v45 }
 0xbcb   : > { %v1649_v47 = vmul.f32 %v1648_v46, %v1648_v46 }
 0xbcd   : > { %v1650_v48 = vsel %vm605_vm5, %v1649_v47, 0.0 }
 0xbce   : > { %1651 = vadd.xlane.f32.xlu1 %v1650_v48 }
 0xc5b   : > { %v1652_v63 = vpop.xlane.xlu1 %1651 }
 0xc5c   : > { %v1653_v0 = vmul.f32 0.03125, %v1652_v63 }
 0xc5e   : > { %v1654_v1 = vadd.f32 1e-05, %v1653_v0 }
 0xc60   : > { %2376 = vrsqrt.f32 %v1654_v1 }
 0xc6a   : > { %v2377_v5 = vpop.eup %2376 }
 0xc6b   : > { %v1656_v6 = vmul.f32 %v2377_v5, %v1648_v46 }
 0xc6d   : > { %v1661_v8 = vmul.f32 %v1660_v4, %v1656_v6 }
 0xc6f   : > { %v1666_v9 = vadd.f32 %v1665_v7, %v1661_v8 }
 0xc71   : > { %2217 = vmatmul.mubr.msk.f32.vlgmr.msra.gmra.mrb[14].mxu0 %vm605_vm5, %v1666_v9 }
 0xd44   : > { %v1747_v16 = vpop.f32.mrb[14].mxu0 }
 0xd45   : > { %v1748_v17 = vadd.f32 %v2076_v14, %v1747_v16  ;;  %v2218_v19 = vpop.f32.mrb[15].mxu0 }
 0xd47   : > { %v1751_v20 = vmax.f32 %v1748_v17, 0.0 }
 0xd49   : > { %2236 = vmatmul.mubr.msk.f32.vlgmr.msra.gmra.mrb[12].mxu1 %vm1764_vm7, %v1751_v20 }
 0xe1c   : > { %v1834_v23 = vpop.f32.mrb[12].mxu1 }
 0xe1d   : > { %v1835_v24 = vadd.f32 %v1834_v23, %v1763_v22  ;;  %v2237_v25 = vpop.f32.mrb[13].mxu1 }
 0xe1f   : > { %v1838_v26 = vadd.f32 %v1835_v24, %v1666_v9 }
 0xe21   : > { %v1839_v27 = vsel %vm605_vm5, %v1838_v26, 0.0 }
 0xe22   : > { %1840 = vadd.xlane.f32.xlu1 %v1839_v27 }
 0xeaf   : > { %v1841_v28 = vpop.xlane.xlu1 %1840 }
 0xeb0   : > { %v1842_v18 = vmul.f32 0.03125, %v1841_v28 }
 0xeb2   : > { %v1843_v29 = vsub.f32 %v1838_v26, %v1842_v18 }
 0xeb4   : > { %v1844_v30 = vmul.f32 %v1843_v29, %v1843_v29 }
 0xeb6   : > { %v1845_v31 = vsel %vm605_vm5, %v1844_v30, 0.0 }
 0xeb7   : > { %1846 = vadd.xlane.f32.xlu1 %v1845_v31 }
 0xf44   : > { %v1847_v32 = vpop.xlane.xlu1 %1846 }
 0xf45   : > { %v1848_v33 = vmul.f32 0.03125, %v1847_v32 }
 0xf47   : > { %v1849_v34 = vadd.f32 1e-05, %v1848_v33 }
 0xf49   : > { %2378 = vrsqrt.f32 %v1849_v34 }
 0xf53   : > { %v2379_v40 = vpop.eup %2378 }
 0xf54   : > { %v1851_v41 = vmul.f32 %v2379_v40, %v1843_v29 }
 0xf56   : > { %v1856_v43 = vmul.f32 %v1855_v39, %v1851_v41 }
 0xf58   : > { %v1861_v13 = vadd.f32 %v1860_v42, %v1856_v43 }
 0xf5a   : > { %1862 = vst.msk [vmem:[%s2736_s5] sm:$0xff] %vm605_vm5, %v1861_v13 }
 0xf5b   : > { %2421 = shalt.err (!%p2418_p11)
}
 0xf5c   : > { %s2422_s5 = scalar_lea.hbm %s2894_s0, 128  ;;  %s2426_s29 = scalar_lea.hbm %s3002_s25, 256 }
 0xf5d   : > { %p2423_p12 = scmp.ne.s32.totalorder %s2894_s0, %s2422_s5  ;;  %p2427_p3 = scmp.lt.u32.totalorder %s2894_s0, %s3002_s25 }
 0xf5e   : > { %p2428_p9 = scmp.lt.u32.totalorder %s2426_s29, %s2422_s5  ;;  %p2430_p13 = scmp.lt.u32.totalorder %s2422_s5, %s2894_s0 }
 0xf5f   : > { %p2424_p1 = pnand %p2423_p12, %p3004_p0 }
 0xf60   : > { %p2429_p10 = por %p2428_p9, %p2427_p3 }
 0xf61   : > { %p2425_p4 = pneg %p2424_p1 }
 0xf62   : > { %p2431_p2 = por %p2430_p13, %p2429_p10 }
 0xf64   : > { %p2432_p5 = pnand %p2431_p2, %p2425_p4 }
 0xf66   : > { %2435 = shalt.err (!%p2432_p5)
}
 0xf67   : > { %2266 = dma.vmem_to_hbm [thread:$0]  (%p3004_p0), %s2896_s28, 128, %s2894_s0, %s1864_s16  }
 0xf68 PF: > { %s3005_s13 = sld [smem:[#allocation12_spill]]  ;;  %s3006_s27 = sld [smem:[#allocation8_spill]] }
 0xf69   : > { %s3007_s10 = sld [smem:[#allocation15_spill]] }
 0xf6e   : > { %p2278_p6 = scmp.ge.s32.totalorder %s3005_s13, 2  ;;  %s1889_s20 = sand.u32 1, %s3006_s27  }
 0xf6f   : > { %p3008_p7 = scmp.ne.s32.totalorder %s3007_s10, 0  ;;  %s1890_s22 = scalar_lea.sflag [#allocation4], %s1889_s20 }
 0xf71   : > { %p2273_p8 = pnand %p2278_p6, %p3008_p7 }
 0xf73   : > { %2473 = dma.done.wait (!%p2273_p8), %s1890_s22, 128  }
 0xf74   : > { %2475 = vsyncadd (!%p2273_p8), %s1890_s22, 4294967168  ;;  %s24_s20 = sadd.s32 1, %s3005_s13   ;;  %s3009_s15 = sld [smem:[#allocation9_spill]] }
 0xf75   : > { %p21_p11 = scmp.ge.s32.totalorder %s24_s20, 6   ;;  %s3010_s26 = sld [smem:[#allocation16_spill]] }
 0xf76   : > { %s3011_s16 = sld [smem:[#allocation10_spill]]  ;;  %s3012_s17 = sld [smem:[#allocation11_spill]] }
 0xf77   : > { %s3013_s18 = sld [smem:[#allocation13_spill]]  ;;  %s3014_s19 = sld [smem:[#allocation14_spill]] }
 0xf78   : > { %s3015_s13 = smov %s2482_s14  ;;  %23 = sbr.rel (!%p21_p11) target bundleno = 12 (0xc), region = 125 }
 0xf7a   : > { %s3016_s14 = smov %s3009_s15 }
 0xf7b   : > { %s3017_s15 = smov %s3010_s26 }
 0xf7f   :  { %1895 = vsyncpa [#allocation3], 1 }
 0xf80   :  { %1897 = vsyncpa [#allocation3 + $0x1], 1 }
 0xf81   :  { %1898 = vsyncpa [#allocation4], 1 }
 0xf82   :  { %1900 = vsyncpa [#allocation4 + $0x1], 1 }

</bundles_post_ra>
